<compile_context>
chip_gen: v7x
topology: tpu7x:2x2x1
jax: 0.10.0
libtpu: 0.0.40
codegen_flags: <defaults>
</compile_context>

<pallas_src>
import math
import jax
import jax.numpy as jnp
from jax import lax
from jax.experimental import pallas as pl
from jax.experimental.pallas import tpu as pltpu


def _make_kernel(num_heads, dk, input_dim, nhidden, scale):
    """Build the per-batch-block kernel body."""
    D = input_dim

    def kernel(q_ref, k_ref, v_ref, m_ref,
               wqh_ref, bqh_ref, wkh_ref, bkh_ref, woh_ref, bo_ref,
               o_ref):
        Bt, Lq, E = q_ref.shape
        _, Lk, _ = k_ref.shape

        # Fold batch into the matmul row dimension (bf16 MXU operands).
        q_flat = q_ref[...].reshape(Bt * Lq, E)                  # bf16
        k_flat = k_ref[...].reshape(Bt * Lk, E)                  # bf16

        v = v_ref[...].astype(jnp.float32)                       # (Bt, Lk, D)
        mb = (m_ref[...] != 0).astype(jnp.float32)               # binary mask
        # Fused attention-apply operand: [mask*value | mask] along lanes.
        mvd = jnp.concatenate([mb * v, mb], axis=-1).astype(jnp.bfloat16)

        # Reference behavior for a fully-masked channel: all scores == -1e9
        # -> uniform softmax -> mean of value over Lk.
        uniform = jnp.sum(v, axis=1, keepdims=True) * (1.0 / Lk)  # (Bt, 1, D)

        def head_body(hi, o_acc):
            # Per-head projection slabs (no sub-128 lane slicing of q/k).
            wq_h = wqh_ref[hi]                                   # (E, dk) bf16
            wk_h = wkh_ref[hi]                                   # (E, dk) bf16
            bq_h = bqh_ref[hi]                                   # (1, dk) f32
            bk_h = bkh_ref[hi]                                   # (1, dk) f32

            qh = jnp.dot(q_flat, wq_h, preferred_element_type=jnp.float32) + bq_h
            kh = jnp.dot(k_flat, wk_h, preferred_element_type=jnp.float32) + bk_h
            qh = (qh * scale).astype(jnp.bfloat16).reshape(Bt, Lq, dk)
            kh = kh.astype(jnp.bfloat16).reshape(Bt, Lk, dk)

            s = jnp.einsum("bqd,bkd->bqk", qh, kh,
                           preferred_element_type=jnp.float32)   # (Bt, Lq, Lk)
            # NOTE: row max is over ALL keys; masked keys drop out of num/den
            # via the mask product.  Only if every surviving key sits >~87
            # below a masked key's score would num/den underflow and hit the
            # uniform fallback (reference would softmax the survivors).
            e = jnp.exp(s - jnp.max(s, axis=-1, keepdims=True))
            e = e.astype(jnp.bfloat16)

            # One MXU matmul yields numerator and denominator together.
            nd = jnp.einsum("bqk,bkd->bqd", e, mvd,
                            preferred_element_type=jnp.float32)  # (Bt, Lq, 2D)
            num = nd[:, :, :D]
            den = nd[:, :, D:]

            fm = den == 0.0                                      # fully masked
            safe = jnp.where(fm, 1.0, den)
            out_h = num * pl.reciprocal(safe, approx=True)       # EUP reciprocal
            out_h = jnp.where(fm, uniform, out_h)                # (Bt, Lq, D)

            # Accumulate straight into the output projection (no lane concat).
            wo_h = woh_ref[hi]                                   # (D, nhidden) bf16
            return o_acc + jnp.dot(
                out_h.reshape(Bt * Lq, D).astype(jnp.bfloat16), wo_h,
                preferred_element_type=jnp.float32)

        o_acc = jnp.zeros((Bt * Lq, nhidden), jnp.float32)
        o_acc = lax.fori_loop(0, num_heads, head_body, o_acc)
        o_ref[...] = (o_acc + bo_ref[...]).reshape(Bt, Lq, nhidden).astype(o_ref.dtype)

    return kernel


def _vmem_bytes_estimate(Bt, Lq, Lk, E, D, nh, h, dk):
    """Rough per-grid-step VMEM bytes: double-buffered I/O + weights + intermediates."""
    act = 2  # bf16 activations
    io = 2 * Bt * (Lq * E + Lk * E + 2 * Lk * D) * act + 2 * Bt * Lq * nh * 4
    w = 2 * (2 * h * E * dk * act + 2 * h * dk * 4 + h * D * nh * act + nh * 4)
    inter = Bt * (2 * Lq * Lk * 4            # s, e
                  + 6 * Lk * D * 4           # v, mb, mv, mvd staging
                  + 4 * Lq * D * 4           # num/den/out_h
                  + 2 * Lq * nh * 4          # o_acc + store temp
                  + (Lq + Lk) * E * act)
    return io + w + inter


def _device_info():
    """(physical VMEM per TensorCore, min grid steps) with a v7x heuristic."""
    try:
        kind = jax.devices()[0].device_kind.lower()
    except Exception:  # pragma: no cover
        kind = ""
    is_v7 = ("v7" in kind) or ("tpu7" in kind)
    phys_vmem = (64 << 20) if is_v7 else (128 << 20)
    min_grid = 4 if is_v7 else 2            # >= 2 steps per TensorCore on v7x
    return phys_vmem, min_grid


def _pick_batch_block(B, Lq, Lk, E, D, nh, h, dk,
                      row_target=256, min_grid=2, vmem_budget=None):
    """Largest divisor of B with Bt*Lq <= row_target, >=min_grid steps, VMEM fit."""
    eff_min_grid = min(min_grid, B)
    bt_target = max(1, row_target // max(Lq, 1))
    best = 1
    for bt in range(1, B + 1):
        if B % bt or bt > bt_target:
            continue
        if (B // bt) < eff_min_grid:
            continue
        if vmem_budget is not None and \
                _vmem_bytes_estimate(bt, Lq, Lk, E, D, nh, h, dk) > vmem_budget:
            continue
        best = bt
    return best


def multi_time_attention_pallas(query, key, value, mask, params,
                                num_heads, embed_time, nhidden,
                                batch_block=None):
    """Pallas forward of multiTimeAttention. Returns (B, Lq, nhidden) float32."""
    # TODO(synk): att_mask / dropout (default None in the PyTorch forward) not supported.
    B, Lq, E = query.shape
    _, Lk, D = value.shape
    assert E == embed_time and embed_time % num_heads == 0
    dk = embed_time // num_heads
    scale = 1.0 / math.sqrt(dk)

    phys_vmem, min_grid = _device_info()
    if batch_block is None:
        Bt = _pick_batch_block(B, Lq, Lk, E, D, nhidden, num_heads, dk,
                               row_target=256, min_grid=min_grid,
                               vmem_budget=phys_vmem // 2)
    else:
        Bt = batch_block
    assert B % Bt == 0, "batch must be divisible by the batch block"

    # bf16 activations: halves streamed HBM bytes (biggest win on v5e) and feeds
    # the MXU at its bf16 rate; all accumulation stays f32 inside the kernel.
    q_bf = query.astype(jnp.bfloat16)
    k_bf = key.astype(jnp.bfloat16)
    v_bf = value.astype(jnp.bfloat16)
    m_bf = mask.astype(jnp.bfloat16)          # 0/1 observation mask

    # nn.Linear stores weight as (out, in); kernel consumes per-head (in, dk)
    # slabs so it never lane-slices the projected q/k.
    wqh = params["wq"].T.reshape(E, num_heads, dk).transpose(1, 0, 2).astype(jnp.bfloat16)
    wkh = params["wk"].T.reshape(E, num_heads, dk).transpose(1, 0, 2).astype(jnp.bfloat16)
    bqh = params["bq"].reshape(num_heads, 1, dk).astype(jnp.float32)
    bkh = params["bk"].reshape(num_heads, 1, dk).astype(jnp.float32)
    woh = params["wo"].T.reshape(num_heads, D, nhidden).astype(jnp.bfloat16)
    bo = params["bo"].reshape(1, nhidden).astype(jnp.float32)

    kernel = _make_kernel(num_heads, dk, D, nhidden, scale)

    flops = 2 * B * (Lq * E * E + Lk * E * E
                     + num_heads * Lq * Lk * dk
                     + num_heads * Lq * Lk * 2 * D
                     + num_heads * Lq * D * nhidden)
    transcendentals = B * num_heads * Lq * Lk
    bytes_accessed = (2 * B * (Lq * E + Lk * E + 2 * Lk * D)
                      + 4 * B * Lq * nhidden
                      + 2 * (2 * E * E + num_heads * D * nhidden)
                      + 4 * (2 * E + nhidden))

    est = _vmem_bytes_estimate(Bt, Lq, Lk, E, D, nhidden, num_heads, dk)
    vmem_limit = int(min(phys_vmem - (16 << 20), max(32 << 20, 2 * est)))

    def _wspec3(shape):
        return pl.BlockSpec(shape, lambda b: (0, 0, 0))

    out = pl.pallas_call(
        kernel,
        out_shape=jax.ShapeDtypeStruct((B, Lq, nhidden), jnp.float32),
        grid_spec=pltpu.PrefetchScalarGridSpec(
            num_scalar_prefetch=0,
            grid=(B // Bt,),
            in_specs=[
                pl.BlockSpec((Bt, Lq, E), lambda b: (b, 0, 0)),        # query
                pl.BlockSpec((Bt, Lk, E), lambda b: (b, 0, 0)),        # key
                pl.BlockSpec((Bt, Lk, D), lambda b: (b, 0, 0)),        # value
                pl.BlockSpec((Bt, Lk, D), lambda b: (b, 0, 0)),        # mask
                _wspec3((num_heads, E, dk)),                           # Wq heads
                _wspec3((num_heads, 1, dk)),                           # bq heads
                _wspec3((num_heads, E, dk)),                           # Wk heads
                _wspec3((num_heads, 1, dk)),                           # bk heads
                _wspec3((num_heads, D, nhidden)),                      # Wo heads
                pl.BlockSpec((1, nhidden), lambda b: (0, 0)),          # bo
            ],
            out_specs=pl.BlockSpec((Bt, Lq, nhidden), lambda b: (b, 0, 0)),
        ),
        compiler_params=pltpu.CompilerParams(
            dimension_semantics=("parallel",),
            vmem_limit_bytes=vmem_limit),
        cost_estimate=pl.CostEstimate(flops=flops,
                                      transcendentals=transcendentals,
                                      bytes_accessed=bytes_accessed),
    )(q_bf, k_bf, v_bf, m_bf, wqh, bqh, wkh, bkh, woh, bo)
    return out


def multi_time_attention_ref(query, key, value, mask, params,
                             num_heads, embed_time, nhidden):
    """Pure-JAX (f32) mirror of the PyTorch forward, for validation."""
    B, Lq, E = query.shape
    _, Lk, D = value.shape
    dk = embed_time // num_heads

    q = query @ params["wq"].T + params["bq"]      # (B, Lq, E)
    k = key @ params["wk"].T + params["bk"]        # (B, Lk, E)
    q = q.reshape(B, Lq, num_heads, dk).transpose(0, 2, 1, 3)   # (B, h, Lq, dk)
    k = k.reshape(B, Lk, num_heads, dk).transpose(0, 2, 1, 3)   # (B, h, Lk, dk)

    scores = jnp.einsum("bhqd,bhkd->bhqk", q, k) / math.sqrt(dk)   # (B,h,Lq,Lk)
    scores = jnp.broadcast_to(scores[..., None], (B, num_heads, Lq, Lk, D))
    mask5 = mask[:, None, None, :, :]                              # (B,1,1,Lk,D)
    scores = jnp.where(mask5 == 0, -1000000000.0, scores)
    p = jax.nn.softmax(scores, axis=-2)
    x = jnp.sum(p * value[:, None, None, :, :], axis=-2)           # (B,h,Lq,D)
    x = x.transpose(0, 2, 1, 3).reshape(B, Lq, num_heads * D)
    return x @ params["wo"].T + params["bo"]


if __name__ == "__main__":
    # Small shapes consistent with the module's forward.
    B, Lq, Lk = 2, 8, 8
    embed_time = 16
    num_heads = 2
    input_dim = 4
    nhidden = 16

    key0 = jax.random.PRNGKey(0)
    ks = jax.random.split(key0, 10)

    query = jax.random.normal(ks[0], (B, Lq, embed_time), jnp.float32)
    key_t = jax.random.normal(ks[1], (B, Lk, embed_time), jnp.float32)
    value = jax.random.normal(ks[2], (B, Lk, input_dim), jnp.float32)
    mask = (jax.random.uniform(ks[3], (B, Lk, input_dim)) > 0.3).astype(jnp.float32)

    # Deterministic parameter init (nn.Linear shapes: weight=(out,in), bias=(out,)).
    params = {
        "wq": 0.1 * jax.random.normal(ks[4], (embed_time, embed_time), jnp.float32),
        "bq": 0.1 * jax.random.normal(ks[5], (embed_time,), jnp.float32),
        "wk": 0.1 * jax.random.normal(ks[6], (embed_time, embed_time), jnp.float32),
        "bk": 0.1 * jax.random.normal(ks[7], (embed_time,), jnp.float32),
        "wo": 0.1 * jax.random.normal(ks[8], (nhidden, input_dim * num_heads),
                                      jnp.float32),
        "bo": 0.1 * jax.random.normal(ks[9], (nhidden,), jnp.float32),
    }

    out = multi_time_attention_pallas(query, key_t, value, mask, params,
                                      num_heads, embed_time, nhidden)
    out = jax.block_until_ready(out)

    ref = multi_time_attention_ref(query, key_t, value, mask, params,
                                   num_heads, embed_time, nhidden)
    assert out.shape == (B, Lq, nhidden)
    # bf16 MXU operands with f32 accumulation -> compare at bf16-level tolerance.
    assert jnp.allclose(out, ref, atol=3e-2, rtol=3e-2), "mismatch vs reference"

    print("KERNEL_OK")
</pallas_src>

<mosaic_0001>
module attributes {stable_mosaic.version = 11 : i64} {
  func.func @kernel(%arg0: i32, %arg1: memref<1x8x16xbf16, #tpu.memory_space<vmem>>, %arg2: memref<1x8x16xbf16, #tpu.memory_space<vmem>>, %arg3: memref<1x8x4xbf16, #tpu.memory_space<vmem>>, %arg4: memref<1x8x4xbf16, #tpu.memory_space<vmem>>, %arg5: memref<2x16x8xbf16, #tpu.memory_space<vmem>>, %arg6: memref<2x1x8xf32, #tpu.memory_space<vmem>>, %arg7: memref<2x16x8xbf16, #tpu.memory_space<vmem>>, %arg8: memref<2x1x8xf32, #tpu.memory_space<vmem>>, %arg9: memref<2x4x16xbf16, #tpu.memory_space<vmem>>, %arg10: memref<1x16xf32, #tpu.memory_space<vmem>>, %arg11: memref<1x8x16xf32, #tpu.memory_space<vmem>>) attributes {dimension_semantics = [#tpu.dimension_semantics<parallel>], iteration_bounds = array<i64: 2>, scalar_prefetch = 0 : i64, scratch_operands = 0 : i64, tpu.core_type = #tpu.core_type<tc>, window_params = [{transform_indices = @transform_0, window_bounds = array<i64: 1, 8, 16>}, {transform_indices = @transform_1, window_bounds = array<i64: 1, 8, 16>}, {transform_indices = @transform_2, window_bounds = array<i64: 1, 8, 4>}, {transform_indices = @transform_3, window_bounds = array<i64: 1, 8, 4>}, {pipeline_mode = #tpu.pipeline_mode<synchronous>, transform_indices = @transform_4, window_bounds = array<i64: 2, 16, 8>}, {pipeline_mode = #tpu.pipeline_mode<synchronous>, transform_indices = @transform_5, window_bounds = array<i64: 2, 1, 8>}, {pipeline_mode = #tpu.pipeline_mode<synchronous>, transform_indices = @transform_6, window_bounds = array<i64: 2, 16, 8>}, {pipeline_mode = #tpu.pipeline_mode<synchronous>, transform_indices = @transform_7, window_bounds = array<i64: 2, 1, 8>}, {pipeline_mode = #tpu.pipeline_mode<synchronous>, transform_indices = @transform_8, window_bounds = array<i64: 2, 4, 16>}, {pipeline_mode = #tpu.pipeline_mode<synchronous>, transform_indices = @transform_9, window_bounds = array<i64: 1, 16>}, {transform_indices = @transform_10, window_bounds = array<i64: 1, 8, 16>}]} {
    %c0 = arith.constant 0 : index
    %c0_0 = arith.constant 0 : index
    %c0_1 = arith.constant 0 : index
    %0 = vector.load %arg1[%c0, %c0_0, %c0_1] : memref<1x8x16xbf16, #tpu.memory_space<vmem>>, vector<1x8x16xbf16>
    %1 = vector.shape_cast %0 : vector<1x8x16xbf16> to vector<8x16xbf16>
    %c0_2 = arith.constant 0 : index
    %c0_3 = arith.constant 0 : index
    %c0_4 = arith.constant 0 : index
    %2 = vector.load %arg2[%c0_2, %c0_3, %c0_4] : memref<1x8x16xbf16, #tpu.memory_space<vmem>>, vector<1x8x16xbf16>
    %3 = vector.shape_cast %2 : vector<1x8x16xbf16> to vector<8x16xbf16>
    %c0_5 = arith.constant 0 : index
    %c0_6 = arith.constant 0 : index
    %c0_7 = arith.constant 0 : index
    %4 = vector.load %arg3[%c0_5, %c0_6, %c0_7] : memref<1x8x4xbf16, #tpu.memory_space<vmem>>, vector<1x8x4xbf16>
    %5 = arith.extf %4 : vector<1x8x4xbf16> to vector<1x8x4xf32>
    %c0_8 = arith.constant 0 : index
    %c0_9 = arith.constant 0 : index
    %c0_10 = arith.constant 0 : index
    %6 = vector.load %arg4[%c0_8, %c0_9, %c0_10] : memref<1x8x4xbf16, #tpu.memory_space<vmem>>, vector<1x8x4xbf16>
    %cst = arith.constant 0.000000e+00 : bf16
    %7 = vector.broadcast %cst : bf16 to vector<1x8x4xbf16>
    %8 = arith.cmpf one, %6, %7 : vector<1x8x4xbf16>
    %9 = arith.extui %8 : vector<1x8x4xi1> to vector<1x8x4xi32>
    %10 = arith.sitofp %9 : vector<1x8x4xi32> to vector<1x8x4xf32>
    %11 = arith.mulf %10, %5 : vector<1x8x4xf32>
    %12 = tpu.concatenate %11, %10 in 2 : vector<1x8x4xf32>, vector<1x8x4xf32> -> vector<1x8x8xf32>
    %13 = arith.truncf %12 : vector<1x8x8xf32> to vector<1x8x8xbf16>
    %cst_11 = arith.constant dense<0.000000e+00> : vector<1x4xf32>
    %14 = vector.multi_reduction <add>, %5, %cst_11 [1] : vector<1x8x4xf32> to vector<1x4xf32>
    %15 = vector.shape_cast %14 : vector<1x4xf32> to vector<1x1x4xf32>
    %cst_12 = arith.constant 1.250000e-01 : f32
    %16 = vector.broadcast %cst_12 : f32 to vector<1x1x4xf32>
    %17 = arith.mulf %15, %16 : vector<1x1x4xf32>
    %cst_13 = arith.constant 0.000000e+00 : f32
    %18 = vector.broadcast %cst_13 : f32 to vector<8x16xf32>
    %c0_i32 = arith.constant 0 : i32
    %c2_i32 = arith.constant 2 : i32
    %19 = arith.addi %c0_i32, %c2_i32 : i32
    %c1_i32 = arith.constant 1 : i32
    %20 = scf.for %arg12 = %c0_i32 to %19 step %c1_i32 iter_args(%arg13 = %18) -> (vector<8x16xf32>)  : i32 {
      %26 = arith.index_cast %arg12 : i32 to index
      %c0_20 = arith.constant 0 : index
      %c0_21 = arith.constant 0 : index
      %27 = vector.load %arg5[%26, %c0_20, %c0_21] : memref<2x16x8xbf16, #tpu.memory_space<vmem>>, vector<1x16x8xbf16>
      %28 = vector.shape_cast %27 : vector<1x16x8xbf16> to vector<16x8xbf16>
      %29 = arith.index_cast %arg12 : i32 to index
      %c0_22 = arith.constant 0 : index
      %c0_23 = arith.constant 0 : index
      %30 = vector.load %arg7[%29, %c0_22, %c0_23] : memref<2x16x8xbf16, #tpu.memory_space<vmem>>, vector<1x16x8xbf16>
      %31 = vector.shape_cast %30 : vector<1x16x8xbf16> to vector<16x8xbf16>
      %32 = arith.index_cast %arg12 : i32 to index
      %c0_24 = arith.constant 0 : index
      %c0_25 = arith.constant 0 : index
      %33 = vector.load %arg6[%32, %c0_24, %c0_25] : memref<2x1x8xf32, #tpu.memory_space<vmem>>, vector<1x1x8xf32>
      %34 = vector.shape_cast %33 : vector<1x1x8xf32> to vector<1x8xf32>
      %35 = arith.index_cast %arg12 : i32 to index
      %c0_26 = arith.constant 0 : index
      %c0_27 = arith.constant 0 : index
      %36 = vector.load %arg8[%35, %c0_26, %c0_27] : memref<2x1x8xf32, #tpu.memory_space<vmem>>, vector<1x1x8xf32>
      %37 = vector.shape_cast %36 : vector<1x1x8xf32> to vector<1x8xf32>
      %cst_28 = arith.constant dense<0.000000e+00> : vector<8x8xf32>
      %38 = tpu.matmul %1, %28, %cst_28 {dimension_numbers = #tpu.dot_dimension_numbers<[1], [0], [0], [1], [0, 0, 1, 1], [], []>} : vector<8x16xbf16>, vector<16x8xbf16>, vector<8x8xf32> -> vector<8x8xf32>
      %39 = vector.broadcast %34 : vector<1x8xf32> to vector<8x8xf32>
      %40 = arith.addf %38, %39 : vector<8x8xf32>
      %cst_29 = arith.constant dense<0.000000e+00> : vector<8x8xf32>
      %41 = tpu.matmul %3, %31, %cst_29 {dimension_numbers = #tpu.dot_dimension_numbers<[1], [0], [0], [1], [0, 0, 1, 1], [], []>} : vector<8x16xbf16>, vector<16x8xbf16>, vector<8x8xf32> -> vector<8x8xf32>
      %42 = vector.broadcast %37 : vector<1x8xf32> to vector<8x8xf32>
      %43 = arith.addf %41, %42 : vector<8x8xf32>
      %cst_30 = arith.constant 0.353553385 : f32
      %44 = vector.broadcast %cst_30 : f32 to vector<8x8xf32>
      %45 = arith.mulf %40, %44 : vector<8x8xf32>
      %46 = arith.truncf %45 : vector<8x8xf32> to vector<8x8xbf16>
      %47 = vector.shape_cast %46 : vector<8x8xbf16> to vector<1x8x8xbf16>
      %48 = arith.truncf %43 : vector<8x8xf32> to vector<8x8xbf16>
      %49 = vector.shape_cast %48 : vector<8x8xbf16> to vector<1x8x8xbf16>
      "tpu.trace_start"() <{level = 10 : i32, message = "bqd,bkd->bqk"}> : () -> ()
      %cst_31 = arith.constant dense<0.000000e+00> : vector<1x8x8xf32>
      %50 = tpu.matmul %47, %49, %cst_31 {dimension_numbers = #tpu.dot_dimension_numbers<[2], [2], [1], [1], [0, 0, 0, 1, 1, 1], [0], [0]>} : vector<1x8x8xbf16>, vector<1x8x8xbf16>, vector<1x8x8xf32> -> vector<1x8x8xf32>
      "tpu.trace_stop"() : () -> ()
      %cst_32 = arith.constant dense<0xFF800000> : vector<1x8xf32>
      %51 = vector.multi_reduction <maximumf>, %50, %cst_32 [2] : vector<1x8x8xf32> to vector<1x8xf32>
      %52 = vector.shape_cast %51 : vector<1x8xf32> to vector<1x8x1xf32>
      %53 = vector.broadcast %52 : vector<1x8x1xf32> to vector<1x8x8xf32>
      %54 = arith.subf %50, %53 : vector<1x8x8xf32>
      %55 = math.exp %54 : vector<1x8x8xf32>
      %56 = arith.truncf %55 : vector<1x8x8xf32> to vector<1x8x8xbf16>
      "tpu.trace_start"() <{level = 10 : i32, message = "bqk,bkd->bqd"}> : () -> ()
      %cst_33 = arith.constant dense<0.000000e+00> : vector<1x8x8xf32>
      %57 = tpu.matmul %56, %13, %cst_33 {dimension_numbers = #tpu.dot_dimension_numbers<[2], [1], [1], [2], [0, 0, 0, 1, 1, 2], [0], [0]>} : vector<1x8x8xbf16>, vector<1x8x8xbf16>, vector<1x8x8xf32> -> vector<1x8x8xf32>
      "tpu.trace_stop"() : () -> ()
      %58 = vector.extract_strided_slice %57 {offsets = [0, 0, 0], sizes = [1, 8, 4], strides = [1, 1, 1]} : vector<1x8x8xf32> to vector<1x8x4xf32>
      %59 = vector.extract_strided_slice %57 {offsets = [0, 0, 4], sizes = [1, 8, 4], strides = [1, 1, 1]} : vector<1x8x8xf32> to vector<1x8x4xf32>
      %cst_34 = arith.constant 0.000000e+00 : f32
      %60 = vector.broadcast %cst_34 : f32 to vector<1x8x4xf32>
      %61 = arith.cmpf oeq, %59, %60 : vector<1x8x4xf32>
      %cst_35 = arith.constant 1.000000e+00 : f32
      %62 = vector.broadcast %cst_35 : f32 to vector<1x8x4xf32>
      %63 = arith.select %61, %62, %59 : vector<1x8x4xi1>, vector<1x8x4xf32>
      %64 = tpu.reciprocal %63 {approx = true} : vector<1x8x4xf32> -> vector<1x8x4xf32>
      %65 = arith.mulf %58, %64 : vector<1x8x4xf32>
      %66 = vector.shape_cast %17 : vector<1x1x4xf32> to vector<1x1x4xf32>
      %67 = vector.broadcast %66 : vector<1x1x4xf32> to vector<1x8x4xf32>
      %68 = arith.select %61, %67, %65 : vector<1x8x4xi1>, vector<1x8x4xf32>
      %69 = arith.index_cast %arg12 : i32 to index
      %c0_36 = arith.constant 0 : index
      %c0_37 = arith.constant 0 : index
      %70 = vector.load %arg9[%69, %c0_36, %c0_37] : memref<2x4x16xbf16, #tpu.memory_space<vmem>>, vector<1x4x16xbf16>
      %71 = vector.shape_cast %70 : vector<1x4x16xbf16> to vector<4x16xbf16>
      %72 = vector.shape_cast %68 : vector<1x8x4xf32> to vector<8x4xf32>
      %73 = arith.truncf %72 : vector<8x4xf32> to vector<8x4xbf16>
      %cst_38 = arith.constant dense<0.000000e+00> : vector<8x16xf32>
      %74 = tpu.matmul %73, %71, %cst_38 {dimension_numbers = #tpu.dot_dimension_numbers<[1], [0], [0], [1], [0, 0, 1, 1], [], []>} : vector<8x4xbf16>, vector<4x16xbf16>, vector<8x16xf32> -> vector<8x16xf32>
      %75 = arith.addf %arg13, %74 : vector<8x16xf32>
      scf.yield %75 : vector<8x16xf32>
    }
    %c2_i32_14 = arith.constant 2 : i32
    %c0_15 = arith.constant 0 : index
    %c0_16 = arith.constant 0 : index
    %21 = vector.load %arg10[%c0_15, %c0_16] : memref<1x16xf32, #tpu.memory_space<vmem>>, vector<1x16xf32>
    %22 = vector.broadcast %21 : vector<1x16xf32> to vector<8x16xf32>
    %23 = arith.addf %20, %22 : vector<8x16xf32>
    %24 = vector.shape_cast %23 : vector<8x16xf32> to vector<1x8x16xf32>
    %c0_17 = arith.constant 0 : index
    %c0_18 = arith.constant 0 : index
    %c0_19 = arith.constant 0 : index
    %25 = vector.load %arg11[%c0_17, %c0_18, %c0_19] : memref<1x8x16xf32, #tpu.memory_space<vmem>>, vector<1x8x16xf32>
    tpu.vector_store %arg11[%c0_17, %c0_18, %c0_19], %24 {strides = array<i32>} : memref<1x8x16xf32, #tpu.memory_space<vmem>>, vector<1x8x16xf32>,
    return
  }
  func.func @transform_0(%arg0: i32) -> (i32, i32, i32) {
    %c0_i32 = arith.constant 0 : i32
    %c0_i32_0 = arith.constant 0 : i32
    %c0_i32_1 = arith.constant 0 : i32
    return %arg0, %c0_i32, %c0_i32_0 : i32, i32, i32
  }
  func.func @transform_1(%arg0: i32) -> (i32, i32, i32) {
    %c0_i32 = arith.constant 0 : i32
    %c0_i32_0 = arith.constant 0 : i32
    %c0_i32_1 = arith.constant 0 : i32
    return %arg0, %c0_i32, %c0_i32_0 : i32, i32, i32
  }
  func.func @transform_2(%arg0: i32) -> (i32, i32, i32) {
    %c0_i32 = arith.constant 0 : i32
    %c0_i32_0 = arith.constant 0 : i32
    %c0_i32_1 = arith.constant 0 : i32
    return %arg0, %c0_i32, %c0_i32_0 : i32, i32, i32
  }
  func.func @transform_3(%arg0: i32) -> (i32, i32, i32) {
    %c0_i32 = arith.constant 0 : i32
    %c0_i32_0 = arith.constant 0 : i32
    %c0_i32_1 = arith.constant 0 : i32
    return %arg0, %c0_i32, %c0_i32_0 : i32, i32, i32
  }
  func.func @transform_4(%arg0: i32) -> (i32, i32, i32) {
    %c0_i32 = arith.constant 0 : i32
    %c0_i32_0 = arith.constant 0 : i32
    %c0_i32_1 = arith.constant 0 : i32
    %c0_i32_2 = arith.constant 0 : i32
    return %c0_i32, %c0_i32_0, %c0_i32_1 : i32, i32, i32
  }
  func.func @transform_5(%arg0: i32) -> (i32, i32, i32) {
    %c0_i32 = arith.constant 0 : i32
    %c0_i32_0 = arith.constant 0 : i32
    %c0_i32_1 = arith.constant 0 : i32
    %c0_i32_2 = arith.constant 0 : i32
    return %c0_i32, %c0_i32_0, %c0_i32_1 : i32, i32, i32
  }
  func.func @transform_6(%arg0: i32) -> (i32, i32, i32) {
    %c0_i32 = arith.constant 0 : i32
    %c0_i32_0 = arith.constant 0 : i32
    %c0_i32_1 = arith.constant 0 : i32
    %c0_i32_2 = arith.constant 0 : i32
    return %c0_i32, %c0_i32_0, %c0_i32_1 : i32, i32, i32
  }
  func.func @transform_7(%arg0: i32) -> (i32, i32, i32) {
    %c0_i32 = arith.constant 0 : i32
    %c0_i32_0 = arith.constant 0 : i32
    %c0_i32_1 = arith.constant 0 : i32
    %c0_i32_2 = arith.constant 0 : i32
    return %c0_i32, %c0_i32_0, %c0_i32_1 : i32, i32, i32
  }
  func.func @transform_8(%arg0: i32) -> (i32, i32, i32) {
    %c0_i32 = arith.constant 0 : i32
    %c0_i32_0 = arith.constant 0 : i32
    %c0_i32_1 = arith.constant 0 : i32
    %c0_i32_2 = arith.constant 0 : i32
    return %c0_i32, %c0_i32_0, %c0_i32_1 : i32, i32, i32
  }
  func.func @transform_9(%arg0: i32) -> (i32, i32) {
    %c0_i32 = arith.constant 0 : i32
    %c0_i32_0 = arith.constant 0 : i32
    %c0_i32_1 = arith.constant 0 : i32
    return %c0_i32, %c0_i32_0 : i32, i32
  }
  func.func @transform_10(%arg0: i32) -> (i32, i32, i32) {
    %c0_i32 = arith.constant 0 : i32
    %c0_i32_0 = arith.constant 0 : i32
    %c0_i32_1 = arith.constant 0 : i32
    return %arg0, %c0_i32, %c0_i32_0 : i32, i32, i32
  }
}

</mosaic_0001>

<bundles_post_ra>
// kernel: tpu_custom_call.1
= control target key start
LH: loop header
LB: loop body
LE: loop exit
PB: predicated region body
PF: predicated region fallthrough
CT: control target
= control target key end

     0   :  { %15 = vsyncpa [#allocation3], 0  ;;  %s1355_s0 = inlined_call_operand.vmem [shape: bf16[2,8,16], index: 0, kind: input, shape index: {}]   ;;  %s1356_s1 = inlined_call_operand.vmem [shape: bf16[2,8,16], index: 1, kind: input, shape index: {}]   ;;  %s1357_s2 = inlined_call_operand.vmem [shape: bf16[2,8,4], index: 2, kind: input, shape index: {}]   ;;  %s1358_s3 = inlined_call_operand.vmem [shape: bf16[2,8,4], index: 3, kind: input, shape index: {}]   ;;  %s1359_s4 = inlined_call_operand.vmem [shape: bf16[2,16,8], index: 4, kind: input, shape index: {}]   ;;  %s1360_s5 = inlined_call_operand.vmem [shape: f32[2,1,8], index: 5, kind: input, shape index: {}]   ;;  %s1361_s6 = inlined_call_operand.vmem [shape: bf16[2,16,8], index: 6, kind: input, shape index: {}]   ;;  %s1362_s7 = inlined_call_operand.vmem [shape: f32[2,1,8], index: 7, kind: input, shape index: {}]   ;;  %s1363_s8 = inlined_call_operand.vmem [shape: bf16[2,4,16], index: 8, kind: input, shape index: {}]   ;;  %s1364_s9 = inlined_call_operand.vmem [shape: f32[1,16], index: 9, kind: input, shape index: {}]   ;;  %s1365_s10 = inlined_call_operand.hbm [shape: f32[2,8,16], index: 10, kind: output, shape index: {}]  }
   0x1   :  { %17 = vsyncpa [#allocation3 + $0x1], 0  ;;  %s1164_s13 = smov 0   ;;  %s1166_s14 = smov 0  }
   0x2   :  { %s1168_s15 = smov 0   ;;  %s1170_s16 = smov 0  }
   0x3 LB: > { %1371 = sst [smem:[#allocation5_spill]] %s1079_s13  ;;  %s1185_s17 = sadd.s32 4294967295, %s1091_s16   ;;  %s1091_s16 = sphi %s1170_s16, %s1381_s16   ;;  %s1087_s15 = sphi %s1168_s15, %s1383_s15   ;;  %s1083_s14 = sphi %s1166_s14, %s1385_s14   ;;  %s1079_s13 = sphi %s1164_s13, %s1384_s13  }
   0x4   : > { %1372 = sst [smem:[#allocation6_spill]] %s1087_s15  ;;  %s878_s18 = sadd.s32 4294967294, %s1091_s16  }
   0x5   : > { %s1189_s19 = sadd.s32 1, %s1091_s16   ;;  %s260_s20 = sadd.s32 1, %s1087_s15 }
   0x6   : > { %1373 = sst [smem:[#allocation7_spill]] %s1189_s19  ;;  %s257_s21 = ssub.s32 %s1091_s16, %s1189_s19 }
   0x7   : > { %p270_p0 = scmp.ne.s32.totalorder %s1087_s15, %s1083_s14  ;;  %p258_p1 = scmp.eq.s32.totalorder %s257_s21, 0 }
   0x8   : > { %p271_p2 = scmp.eq.s32.totalorder %s1185_s17, 1  ;;  %p276_p3 = scmp.ne.s32.totalorder %s1083_s14, %s1079_s13 }
   0x9   : > { %p277_p4 = scmp.eq.s32.totalorder %s878_s18, 1  ;;  %p881_p7 = scmp.ge.s32.totalorder %s1091_s16, 1 }
   0xa   : > { %s1200_s22 = scalar_select %p258_p1, %s1087_s15, %s260_s20  }
   0xb   : > { %p1202_p5 = por %p271_p2, %p270_p0  ;;  %p1206_p6 = por %p277_p4, %p276_p3 }
   0xc   : > { %1374 = sst [smem:[#allocation8_spill]] %s1200_s22  ;;  %p341_p8 = scmp.lt.s32.totalorder %s1091_s16, 3 }
   0xd   : > { %s1376_s24 = scalar_select %p1206_p6, 1, 0 }
   0xe   : > { %p342_p9 = pnand %p881_p7, %p341_p8 }
   0xf   : > { %1377 = sst [smem:[#allocation9_spill]] %s1376_s24  ;;  %s387_s25 = sand.u32 (!%p342_p9), 1, %s1083_s14   ;;  %vm425_vm0 = vcmask (!%p342_p9), 31744   ;;  %v1101_v5 = vmov (!%p342_p9), 0   ;;  %v1102_v10 = vmov (!%p342_p9), 0.0   ;;  %v1244_v22 = vmov (!%p342_p9), 0.0  }
  0x10   : > { %345 = sbr.rel (%p342_p9) target bundleno = 1565 (0x61d), region = 60  ;;  %p390_p10 = scmp.lt.s32.totalorder (!%p342_p9), %s1185_s17, 1 }
  0x11   : > { %s1216_s26 = sshll.u32 (!%p342_p9), %s387_s25, 3  ;;  %s1103_s19 = smov (!%p342_p9), 4  }
  0x17   : > { %s391_s27 = scalar_select %p390_p10, %s1185_s17, 1 }
  0x19   : > { %s883_s28 = sshll.u32 %s391_s27, 2 }
  0x1a   : > { %s393_s11 = scalar_lea.vmem %s1355_s0, %s883_s28  ;;  %s397_s20 = scalar_lea.vmem %s1356_s1, %s883_s28 }
  0x1b   : > { %s401_s15 = scalar_lea.vmem %s1357_s2, %s883_s28  ;;  %s405_s13 = scalar_lea.vmem %s1358_s3, %s883_s28  ;;  %v1231_v0 = vld [vmem:[%s393_s11] sm:$0xf] }
  0x1c   : > { %v1233_v1 = vld [vmem:[%s397_s20] sm:$0xf] }
  0x1d   : > { %v411_v2 = vld [vmem:[%s401_s15] sm:$0xf]  ;;  %s1246_s15 = smov 0  }
  0x1e   : > { %v413_v3 = vld [vmem:[%s405_s13] sm:$0xf]  ;;  %v412_v4 = vunpack.c.l.bf16 %v411_v2  ;;  %s389_s13 = scalar_lea.vmem [#allocation2], %s1216_s26 }
  0x1f   : > { %vm414_vm1 = vcmp.ne.bf16.partialorder %v413_v3, 0 }
  0x20   : > { %v415_v6 = vsel %vm414_vm1, 65537, %v1101_v5  ;;  %v428_v8 = vsel %vm425_vm0, %v412_v4, 0.0 }
  0x21   : > { %v416_v7 = vunpack.c.l.b16 %v415_v6  ;;  %v429_v9 = vrot.slane %v428_v8, 4 }
  0x23   : > { %vm417_vm2 = vcmp.ne.s32.totalorder %v416_v7, 0  ;;  %v430_v12 = vadd.f32 %v429_v9, %v428_v8 }
  0x24   : > { %v887_v11 = vsel %vm417_vm2, 1.0, %v1102_v10 }
  0x25   : > { %v420_v13 = vmul.f32 %v887_v11, %v412_v4  ;;  %422 = vrot.lane.b32.xlu0 %v887_v11, %s1103_s19  ;;  %v431_v14 = vrot.slane %v430_v12, 2 }
  0x27   : > { %v432_v15 = vadd.f32 %v431_v14, %v430_v12 }
  0x29   : > { %v433_v16 = vrot.slane %v432_v15, 1 }
  0x2b   : > { %v434_v17 = vadd.f32 %v433_v16, %v432_v15 }
  0x2d   : > { %v1236_v18 = vmul.f32 0.125, %v434_v17 }
  0x97   : > { %v423_v19 = vpop.permute.xlu0 %422 }
  0x98   : > { %v1239_v20 = vsel %vm425_vm0, %v420_v13, %v423_v19 }
  0x99   : > { %v427_v21 = vpack.c.bf16 %v1239_v20, %v1239_v20 }
  0x9a LB: >> { %v1104_v23 = vmov 0.0   ;;  %vm1105_vm3 = vmmov 0   ;;  %s906_s22 = sshll.u32 %s1099_s15, 3  ;;  %vm468_vm4 = vcmask 130048   ;;  %s454_s20 = scalar_lea.vmem %s1362_s7, %s1099_s15  ;;  %vm570_vm5 = vcmask 64512   ;;  %s1099_s15 = sphi %s1246_s15, %s441_s15   ;;  %v1095_v22 = vphi %v1244_v22, %v1378_v22  }
  0x9b   : >> { %924 = vmatprep.subr.bf16.mxu1 %v1104_v23  ;;  %926 = vmatprep.mubr.msk.bf16.mxu1 %vm1105_vm3, %v1104_v23  ;;  %s449_s28 = scalar_lea.vmem %s1361_s6, %s906_s22  ;;  %s445_s11 = scalar_lea.vmem %s1359_s4, %s906_s22  ;;  %v894_v26 = vld [vmem:[%s454_s20] ss:$0 sm:$0xff]  ;;  %vm627_vm6 = vcmask 1043456   ;;  %vm698_vm8 = vcmask 1041408  }
  0x9c   : >> { %918 = vmatprep.subr.bf16.mxu0 %v1104_v23  ;;  %920 = vmatprep.mubr.msk.bf16.mxu0 %vm1105_vm3, %v1104_v23  ;;  %v1015_v24 = vld [vmem:[%s449_s28] sm:$0xff]   ;;  %s452_s22 = scalar_lea.vmem %s1360_s5, %s1099_s15  ;;  %v629_v47 = vsel %vm627_vm6, %v427_v21, 0  ;;  %s1106_s24 = smov 124  }
  0x9d   : >> { %v1016_v25 = vld [vmem:[%s445_s11] sm:$0xff]   ;;  %925 = vmatpush3.bf16.msra.mxu1 %v1015_v24  ;;  %s899_s27 = sshll.u32 %s1099_s15, 1  ;;  %s1107_s11 = smov 4  }
  0x9e   : >> { %919 = vmatpush3.bf16.msra.mxu0 %v1016_v25  ;;  %936 = vmatprep.subr.bf16.mxu1 %v1104_v23  ;;  %v891_v27 = vld [vmem:[%s452_s22] ss:$0 sm:$0xff]  ;;  %s689_s30 = scalar_lea.vmem %s1363_s8, %s899_s27  ;;  %s441_s15 = sadd.s32 1, %s1099_s15  }
  0x9f   : >> { %930 = vmatprep.subr.bf16.mxu0 %v1104_v23  ;;  %v690_v59 = vld [vmem:[%s689_s30] sm:$0x3]  ;;  %p438_p11 = scmp.ge.s32.totalorder %s441_s15, 2  }
  0xa0   : >> { %927 = vmatmul.mubr.msk.bf16.vlgmr.msra.gmra.mrb[0].mxu1 %vm468_vm4, %v1233_v1  ;;  %v700_v61 = vsel %vm698_vm8, %v690_v59, 0  ;;  %v901_v13 = vld [vmem:[%s1364_s9] ss:$0 sm:$0xff] (%p438_p11)  ;;  %s903_s20 = sshll.u32 (%p438_p11), %s1185_s17, 7  ;;  %s754_s15 = scalar_lea.sflag (%p438_p11), [#allocation3], %s387_s25 }
  0xa1   : >> { %921 = vmatmul.mubr.msk.bf16.vlgmr.msra.gmra.mrb[0].mxu0 %vm468_vm4, %v1231_v0  ;;  %938 = vmatprep.mubr.msk.bf16.mxu1 %vm1105_vm3, %v1104_v23  ;;  %s1306_s22 = scalar_lea.hbm (%p438_p11), %s1365_s10, %s903_s20  ;;  %s1108_s17 = smov (%p438_p11), [#allocation2]  }
  0xa2   : >> { %932 = vmatprep.mubr.msk.bf16.mxu0 %vm1105_vm3, %v1104_v23  ;;  %937 = vmatpush3.bf16.msra.mxu1 %v629_v47  ;;  %s1025_s28 = sshll.u32 (%p438_p11), %s1108_s17, 4  ;;  %s1026_s28 = int_to_ptr.vmem [resolvable:$false] %s1025_s28 }
  0xa3   : > { %s1027_s29 = scalar_lea.vmem (%p438_p11), %s1026_s28, 256 }
 0x173   : >> { %v561_v28 = vpop.f32.mrb[0].mxu1 }
 0x174   : >> { %v562_v29 = vadd.f32 %v894_v26, %v561_v28  ;;  %v928_v30 = vpop.f32.mrb[1].mxu1  ;;  %v506_v31 = vpop.f32.mrb[0].mxu0 }
 0x175   : >> { %v564_v32 = vpop.f32.mrb[2].mxu1  ;;  %v507_v33 = vadd.f32 %v891_v27, %v506_v31  ;;  %v922_v34 = vpop.f32.mrb[1].mxu0 }
 0x176   : >> { %v569_v35 = vpack.c.bf16 %v562_v29, %v562_v29  ;;  %v929_v36 = vpop.f32.mrb[3].mxu1  ;;  %v509_v37 = vpop.f32.mrb[2].mxu0 }
 0x177   : >> { %v923_v38 = vpop.f32.mrb[3].mxu0  ;;  %v567_v40 = vmul.f32 0.35355338, %v507_v33 }
 0x178   : >> { %v575_v39 = vsel %vm570_vm5, %v569_v35, 0 }
 0x179   : >> { %931 = vmatpush3.bf16.xpose.msra.mxu0 %v575_v39  ;;  %v568_v41 = vpack.c.bf16 %v567_v40, %v567_v40 }
 0x17a   : >> { %942 = vmatprep.subr.bf16.mxu0 %v1104_v23 }
 0x180   : >> { %933 = vmatmul.mubr.msk.bf16.vlgmr.msra.gmra.mrb[4].mxu0 %vm570_vm5, %v568_v41 }
 0x181   : >> { %944 = vmatprep.mubr.msk.bf16.mxu0 %vm1105_vm3, %v1104_v23  ;;  %943 = vmatpush3.bf16.msra.mxu0 %v700_v61 }
 0x253   : >> { %v611_v42 = vpop.f32.mrb[4].mxu0 }
 0x254   : >> { %v934_v43 = vpop.f32.mrb[5].mxu0  ;;  %v617_v44 = vsel %vm570_vm5, %v611_v42, -inf }
 0x255   : >> { %618 = vmax.xlane.f32.xlu0 %v617_v44  ;;  %v614_v45 = vpop.f32.mrb[6].mxu0 }
 0x256   : >> { %v935_v46 = vpop.f32.mrb[7].mxu0 }
 0x2e2   : >> { %v619_v48 = vpop.xlane.xlu0 %618 }
 0x2e3   : >> { %v620_v49 = vsub.f32 %v611_v42, %v619_v48 }
 0x2e5   : >> { %v621_v50 = vmul.f32 1.442695, %v620_v49 }
 0x2e7   : >> { %1017 = vpow2.f32 %v621_v50 }
 0x2f1   : >> { %v1018_v51 = vpop.eup %1017 }
 0x2f2   : >> { %v623_v52 = vpack.c.bf16 %v1018_v51, %v1018_v51 }
 0x2f4   : >> { %939 = vmatmul.mubr.msk.bf16.vlgmr.msra.gmra.mrb[4].mxu1 %vm570_vm5, %v623_v52 }
 0x3c7   : >> { %v665_v53 = vpop.f32.mrb[4].mxu1 }
 0x3c8   : >> { %vm671_vm7 = vcmp.eq.f32.partialorder %v665_v53, 0.0  ;;  %v940_v54 = vpop.f32.mrb[5].mxu1 }
 0x3c9   : >> { %v672_v55 = vsel %vm671_vm7, 1.0, %v665_v53  ;;  %v668_v56 = vpop.f32.mrb[6].mxu1 }
 0x3ca   : >> { %1019 = vrcp.f32 %v672_v55  ;;  %v941_v57 = vpop.f32.mrb[7].mxu1 }
 0x3d4   : >> { %v1020_v58 = vpop.eup %1019 }
 0x3d5   : >> { %675 = vrot.lane.b32.xlu0 %v1020_v58, %s1106_s24 }
 0x447   : >> { %v676_v60 = vpop.permute.xlu0 %675 }
 0x448   : >> { %v678_v62 = vmul.f32 %v676_v60, %v665_v53 }
 0x44a   : >> { %v1010_v63 = vpack.i.bf16 %v678_v62, %v1236_v18 }
 0x44c   : >> { %1011 = vrot.lane.b32.xlu1 %v1010_v63, %s1107_s11 }
 0x4be   : >> { %v1012_v2 = vpop.permute.xlu1 %1011 }
 0x4bf   : >> { %v1014_v3 = vunpack.i.h.bf16 %v1012_v2  ;;  %v1013_v4 = vunpack.i.l.bf16 %v1012_v2 }
 0x4c1   : >> { %v687_v5 = vsel %vm671_vm7, %v1013_v4, %v1014_v3 }
 0x4c2   : >> { %v691_v6 = vpack.c.bf16 %v687_v5, %v687_v5 }
 0x4c4   : >> { %693 = vrot.lane.b32.xlu1 %v691_v6, %s1106_s24  ;;  %s767_s24 = sshll.u32 (%p438_p11), %s389_s13, 4  ;;  %s1310_s24 = int_to_ptr.vmem [resolvable:$true] %s767_s24 }
 0x4c5   : > { %s1021_s27 = scalar_lea.vmem (%p438_p11), %s1310_s24, 128  ;;  %p1028_p1 = scmp.lt.s32.totalorder (%p438_p11), %s1310_s24, %s1026_s28 }
 0x4c6   : > { %p1022_p12 = scmp.ne.s32.totalorder (%p438_p11), %s1310_s24, %s1021_s27  ;;  %p1029_p2 = scmp.lt.s32.totalorder (%p438_p11), %s1027_s29, %s1021_s27 }
 0x4c8   : > { %p1023_p13 = pnand (%p438_p11), %p1022_p12, %p1202_p5  ;;  %p1030_p3 = por (%p438_p11), %p1029_p2, %p1028_p1 }
 0x4ca   : > { %p1024_p0 = pneg (%p438_p11), %p1023_p13 }
 0x4cc   : > { %p1031_p4 = pnand (%p438_p11), %p1030_p3, %p1024_p0 }
 0x536   : >> { %v694_v7 = vpop.permute.xlu1 %693 }
 0x537   : >> { %945 = vmatmul.mubr.msk.bf16.vlgmr.msra.gmra.mrb[8].mxu0 %vm425_vm0, %v694_v7 }
 0x607   : > { %440 = sbr.rel (!%p438_p11) target bundleno = 154 (0x9a), region = 116 }
 0x60a   : >> { %v736_v8 = vpop.f32.mrb[8].mxu0 }
 0x60b   : >> { %v742_v9 = vadd.f32 %v1095_v22, %v736_v8   ;;  %v946_v10 = vpop.f32.mrb[9].mxu0 }
 0x60c   : >> { %v739_v11 = vpop.f32.mrb[10].mxu0 }
 0x60d   : >> { %v947_v12 = vpop.f32.mrb[11].mxu0  ;;  %v1378_v22 = vmov %v742_v9  ;;  %v750_v14 = vadd.f32 (%p438_p11), %v901_v13, %v742_v9 }
 0x60f   : > { %752 = vst.msk [vmem:[%s389_s13] sm:$0xff] %vm468_vm4, %v750_v14 }
 0x610   : > { %1034 = shalt.err (!%p1031_p4)
}
 0x611   : > { %s1035_s25 = scalar_lea.hbm %s1306_s22, 128  ;;  %s1039_s30 = scalar_lea.hbm %s1365_s10, 256 }
 0x612   : > { %p1036_p7 = scmp.ne.s32.totalorder %s1306_s22, %s1035_s25  ;;  %p1040_p10 = scmp.lt.u32.totalorder %s1306_s22, %s1365_s10 }
 0x613   : > { %p1041_p11 = scmp.lt.u32.totalorder %s1039_s30, %s1035_s25  ;;  %p1043_p13 = scmp.lt.u32.totalorder %s1035_s25, %s1306_s22 }
 0x614   : > { %p1037_p8 = pnand %p1036_p7, %p1202_p5 }
 0x615   : > { %p1042_p12 = por %p1041_p11, %p1040_p10 }
 0x616   : > { %p1038_p9 = pneg %p1037_p8 }
 0x617   : > { %p1044_p0 = por %p1043_p13, %p1042_p12 }
 0x619   : > { %p1045_p1 = pnand %p1044_p0, %p1038_p9 }
 0x61b   : > { %1048 = shalt.err (!%p1045_p1)
}
 0x61c   : > { %948 = dma.vmem_to_hbm [thread:$0]  (%p1202_p5), %s1310_s24, 128, %s1306_s22, %s754_s15  }
 0x61d PF: > { %s1379_s18 = sld [smem:[#allocation5_spill]]  ;;  %p954_p2 = scmp.ge.s32.totalorder %s1091_s16, 2 }
 0x61f   : > { %p951_p3 = pnand %p954_p2, %p1206_p6 }
 0x623   : > { %s779_s21 = sand.u32 1, %s1379_s18  }
 0x624   : > { %s780_s19 = scalar_lea.sflag [#allocation3], %s779_s21 }
 0x625   : > { %1074 = dma.done.wait (!%p951_p3), %s780_s19, 128  }
 0x626   : > { %1076 = vsyncadd (!%p951_p3), %s780_s19, 4294967168  ;;  %s1381_s16 = sld [smem:[#allocation7_spill]]  ;;  %s1382_s27 = sld [smem:[#allocation6_spill]] }
 0x627   : > { %s1383_s15 = sld [smem:[#allocation8_spill]]  ;;  %s1384_s13 = smov %s1083_s14 }
 0x62c   : > { %p20_p4 = scmp.ge.s32.totalorder %s1381_s16, 4   ;;  %s1385_s14 = smov %s1382_s27 }
 0x62e   :  { %22 = sbr.rel (!%p20_p4) target bundleno = 3 (0x3), region = 127 }
 0x635   :  { %785 = vsyncpa [#allocation3], 1 }
 0x636   :  { %787 = vsyncpa [#allocation3 + $0x1], 1 }

</bundles_post_ra>
